<compile_context>
chip_gen: v5e
topology: v5e:2x2
jax: 0.10.0
libtpu: 0.0.40
codegen_flags: <defaults>
</compile_context>

<pallas_src>
import functools
from collections import OrderedDict

import jax
import jax.numpy as jnp
from jax.experimental import pallas as pl
from jax.experimental.pallas import tpu as pltpu


# MXU operand dtype.  bf16 is the native MXU operand dtype on v5e/v6e/v7x;
# accumulation is f32 (preferred_element_type), elementwise math stays f32.
MXU_OPERAND_DTYPE = jnp.bfloat16


# ----------------------------------------------------------------------------
# Fused kernel: conv(3x3, pad=1) -> BatchNorm(train, batch stats) -> ReLU
#               -> flatten(NCHW order) -> linear
# ----------------------------------------------------------------------------
def _fused_forward_kernel(p_ref, wm_ref, g_ref, b_ref, wl_ref, fb_ref,
                          o_ref, z3_ref, *, N, HW, C, F, eps):
    # Layouts (lane-dense on the big axes):
    #   p_ref : (KH*KW*C_in, N*HW)  im2col patches, cols n-major, bf16
    #   wm_ref: (C, KH*KW*C_in)     conv weight as matmul LHS, bf16
    #   g_ref/b_ref: (C, 1)         BN gamma / beta, f32
    #   wl_ref: (C, F, HW)          fc weight, HW lane-dense last dim, bf16
    #   fb_ref: (1, F)              fc bias, f32
    #   o_ref : (N, F)              output, f32
    #   z3_ref: (C, N, HW)          f32 VMEM scratch (restages activations for
    #                               the batched fc contraction)

    # ---- conv as ONE im2col matmul: (C, K) @ (K, N*HW) -> (C, N*HW) f32 ----
    z = jnp.dot(wm_ref[...], p_ref[...], preferred_element_type=jnp.float32)
    # NOTE: conv bias intentionally omitted — a per-channel constant cancels
    # exactly in training-mode BN (z - mean) and does not affect the variance,
    # so the returned activations are identical without it.

    # ---- BatchNorm training mode (biased batch stats over N,H,W) + ReLU ----
    # Per-channel stats are last-axis (lane) reductions over N*HW lanes.
    mean = jnp.mean(z, axis=1, keepdims=True)               # (C, 1)
    zc = z - mean
    var = jnp.mean(zc * zc, axis=1, keepdims=True)          # biased variance
    z = zc * jax.lax.rsqrt(var + eps) * g_ref[...] + b_ref[...]
    z = jnp.maximum(z, 0.0)                                 # ReLU
    # TODO(synk): running_mean/running_var momentum updates (training-mode
    #             side effect, not part of the functional output) are not
    #             materialized.

    # ---- Linear: out[n, f] = sum_{c,hw} z[c, n*HW + hw] * wl[c, f, hw] -----
    # Restage (C, N*HW) -> (C, N, HW) through a tiny VMEM scratch (avoids
    # relying on an in-register 3-D reshape), then ONE batched dot_general
    # (batch = C, contraction = HW) and a cheap sum over the C batch dim.
    for n in range(N):                                      # N small & static
        z3_ref[:, n, :] = z[:, n * HW:(n + 1) * HW]
    acc = jax.lax.dot_general(
        z3_ref[...].astype(wl_ref.dtype), wl_ref[...],
        dimension_numbers=(((2,), (2,)), ((0,), (0,))),
        preferred_element_type=jnp.float32)                 # (C, N, F)
    out = jnp.sum(acc, axis=0) + fb_ref[...]                # (N, F)
    o_ref[...] = out.astype(o_ref.dtype)                    # single store


# ----------------------------------------------------------------------------
# Glue: im2col with columns ordered (n, h, w) and rows ordered (kh, kw, c_in).
# ----------------------------------------------------------------------------
def _im2col_nmajor(x_nchw, KH, KW):
    N, C_in, H, W = x_nchw.shape
    xp = jnp.pad(x_nchw, ((0, 0), (0, 0), (KH // 2, KH // 2), (KW // 2, KW // 2)))
    taps = []
    for kh in range(KH):
        for kw in range(KW):
            taps.append(xp[:, :, kh:kh + H, kw:kw + W])     # (N, C_in, H, W)
    p = jnp.stack(taps, axis=0)                             # (KH*KW, N, C_in, H, W)
    p = p.transpose(0, 2, 1, 3, 4)                          # (KH*KW, C_in, N, H, W)
    return p.reshape(KH * KW * C_in, N * H * W)
    # TODO(synk): at larger H*W/N, fold im2col into the kernel (shifted
    #             matmuls / pltpu.roll) to avoid the 9x patch expansion.


# ----------------------------------------------------------------------------
# Jitted impl: consumes the six parameters positionally, exactly like
# MetaModule's `iter(parameters.values())`.
# ----------------------------------------------------------------------------
@functools.partial(jax.jit, static_argnames=("bn_eps",))
def _meta_forward_impl(x_nchw, conv_w, conv_b, bn_g, bn_b, fc_w, fc_b,
                       bn_eps=1e-5):
    del conv_b  # cancels in training-mode BN; see kernel note.
    N, C_in, H, W = x_nchw.shape
    C_out, _, KH, KW = conv_w.shape
    HW = H * W
    F_out = fc_w.shape[0]
    K = KH * KW * C_in
    dt = MXU_OPERAND_DTYPE

    # Layout prep (fused by jit into a few small XLA ops):
    p = _im2col_nmajor(x_nchw, KH, KW).astype(dt)                    # (K, N*HW)
    wm = conv_w.transpose(0, 2, 3, 1).reshape(C_out, K).astype(dt)   # (C, K)
    # fc weight columns are NCHW-flatten order c*HW + hw; repack so the big
    # HW axis is the (lane-dense) last dim.
    wl = fc_w.reshape(F_out, C_out, HW).transpose(1, 0, 2).astype(dt)  # (C,F,HW)

    kernel = functools.partial(_fused_forward_kernel, N=N, HW=HW, C=C_out,
                               F=F_out, eps=bn_eps)
    return pl.pallas_call(
        kernel,
        out_shape=jax.ShapeDtypeStruct((N, F_out), jnp.float32),
        grid=(1,),
        in_specs=[
            pl.BlockSpec((K, N * HW), lambda i: (0, 0)),
            pl.BlockSpec((C_out, K), lambda i: (0, 0)),
            pl.BlockSpec((C_out, 1), lambda i: (0, 0)),
            pl.BlockSpec((C_out, 1), lambda i: (0, 0)),
            pl.BlockSpec((C_out, F_out, HW), lambda i: (0, 0, 0)),
            pl.BlockSpec((1, F_out), lambda i: (0, 0)),
        ],
        out_specs=pl.BlockSpec((N, F_out), lambda i: (0, 0)),
        scratch_shapes=[pltpu.VMEM((C_out, N, HW), jnp.float32)],
        compiler_params=pltpu.CompilerParams(
            dimension_semantics=("arbitrary",)),
    )(p, wm,
      bn_g.reshape(C_out, 1).astype(jnp.float32),
      bn_b.reshape(C_out, 1).astype(jnp.float32),
      wl,
      fc_b.reshape(1, F_out).astype(jnp.float32))


# ----------------------------------------------------------------------------
# MetaModule.forward(input, parameters): run the wrapped net with externally
# supplied parameters (named_parameters order:
# conv.weight, conv.bias, bn.weight, bn.bias, fc.weight, fc.bias).
# ----------------------------------------------------------------------------
def meta_module_forward(x_nchw, parameters, *, bn_eps=1e-5):
    return _meta_forward_impl(x_nchw, *parameters.values(), bn_eps=bn_eps)


# ----------------------------------------------------------------------------
# Pure-JAX f32 reference of the same forward (for correctness check).
# ----------------------------------------------------------------------------
def reference_forward(x_nchw, parameters, bn_eps=1e-5):
    conv_w, conv_b, bn_g, bn_b, fc_w, fc_b = [parameters[k] for k in parameters]
    y = jax.lax.conv_general_dilated(
        x_nchw, conv_w, window_strides=(1, 1), padding=((1, 1), (1, 1)),
        dimension_numbers=("NCHW", "OIHW", "NCHW"),
        precision=jax.lax.Precision.HIGHEST)
    y = y + conv_b[None, :, None, None]
    mean = y.mean(axis=(0, 2, 3), keepdims=True)
    var = jnp.square(y - mean).mean(axis=(0, 2, 3), keepdims=True)
    y = ((y - mean) * jax.lax.rsqrt(var + bn_eps) * bn_g[None, :, None, None]
         + bn_b[None, :, None, None])
    y = jnp.maximum(y, 0.0)
    y = y.reshape(y.shape[0], -1)
    return jnp.dot(y, fc_w.T, precision=jax.lax.Precision.HIGHEST) + fc_b


if __name__ == "__main__":
    key = jax.random.PRNGKey(0)
    N, C_in, H, W = 2, 4, 16, 16
    C_out, KH, KW = 8, 3, 3
    F_out = 10

    ks = jax.random.split(key, 7)
    x = jax.random.normal(ks[0], (N, C_in, H, W), jnp.float32)

    # deterministic "external" parameter dict (what MetaModule.forward takes)
    params = OrderedDict()
    params["conv.weight"] = 0.1 * jax.random.normal(ks[1], (C_out, C_in, KH, KW), jnp.float32)
    params["conv.bias"] = 0.1 * jax.random.normal(ks[2], (C_out,), jnp.float32)
    params["bn.weight"] = 1.0 + 0.1 * jax.random.normal(ks[3], (C_out,), jnp.float32)
    params["bn.bias"] = 0.1 * jax.random.normal(ks[4], (C_out,), jnp.float32)
    params["fc.weight"] = 0.05 * jax.random.normal(ks[5], (F_out, C_out * H * W), jnp.float32)
    params["fc.bias"] = 0.05 * jax.random.normal(ks[6], (F_out,), jnp.float32)

    out = meta_module_forward(x, params)
    out = jax.block_until_ready(out)

    ref = reference_forward(x, params)
    assert out.shape == (N, F_out), out.shape
    max_err = float(jnp.max(jnp.abs(out - ref)))
    # bf16 matmul operands (f32 accumulation) over the K=2048 fc contraction
    # bound the expected error to ~1e-2 at these weight/activation scales.
    assert jnp.allclose(out, ref, atol=3e-2, rtol=3e-2), f"max_err={max_err}"

    print("KERNEL_OK")
</pallas_src>

<mosaic_0001>
module attributes {stable_mosaic.version = 11 : i64} {
  func.func @_fused_forward_kernel(%arg0: i32, %arg1: memref<36x512xbf16, #tpu.memory_space<vmem>>, %arg2: memref<8x36xbf16, #tpu.memory_space<vmem>>, %arg3: memref<8x1xf32, #tpu.memory_space<vmem>>, %arg4: memref<8x1xf32, #tpu.memory_space<vmem>>, %arg5: memref<8x10x256xbf16, #tpu.memory_space<vmem>>, %arg6: memref<1x10xf32, #tpu.memory_space<vmem>>, %arg7: memref<2x10xf32, #tpu.memory_space<vmem>>, %arg8: memref<8x2x256xf32, #tpu.memory_space<vmem>>) attributes {dimension_semantics = [#tpu.dimension_semantics<arbitrary>], iteration_bounds = array<i64: 1>, scalar_prefetch = 0 : i64, scratch_operands = 1 : i64, tpu.core_type = #tpu.core_type<tc>, window_params = [{pipeline_mode = #tpu.pipeline_mode<synchronous>, transform_indices = @transform_0, window_bounds = array<i64: 36, 512>}, {pipeline_mode = #tpu.pipeline_mode<synchronous>, transform_indices = @transform_1, window_bounds = array<i64: 8, 36>}, {pipeline_mode = #tpu.pipeline_mode<synchronous>, transform_indices = @transform_2, window_bounds = array<i64: 8, 1>}, {pipeline_mode = #tpu.pipeline_mode<synchronous>, transform_indices = @transform_3, window_bounds = array<i64: 8, 1>}, {pipeline_mode = #tpu.pipeline_mode<synchronous>, transform_indices = @transform_4, window_bounds = array<i64: 8, 10, 256>}, {pipeline_mode = #tpu.pipeline_mode<synchronous>, transform_indices = @transform_5, window_bounds = array<i64: 1, 10>}, {pipeline_mode = #tpu.pipeline_mode<synchronous>, transform_indices = @transform_6, window_bounds = array<i64: 2, 10>}]} {
    %c0 = arith.constant 0 : index
    %c0_0 = arith.constant 0 : index
    %0 = vector.load %arg2[%c0, %c0_0] : memref<8x36xbf16, #tpu.memory_space<vmem>>, vector<8x36xbf16>
    %c0_1 = arith.constant 0 : index
    %c0_2 = arith.constant 0 : index
    %1 = vector.load %arg1[%c0_1, %c0_2] : memref<36x512xbf16, #tpu.memory_space<vmem>>, vector<36x512xbf16>
    %cst = arith.constant dense<0.000000e+00> : vector<8x512xf32>
    %2 = tpu.matmul %0, %1, %cst {dimension_numbers = #tpu.dot_dimension_numbers<[1], [0], [0], [1], [0, 0, 1, 1], [], []>} : vector<8x36xbf16>, vector<36x512xbf16>, vector<8x512xf32> -> vector<8x512xf32>
    %cst_3 = arith.constant dense<0.000000e+00> : vector<8xf32>
    %3 = vector.multi_reduction <add>, %2, %cst_3 [1] : vector<8x512xf32> to vector<8xf32>
    %4 = vector.shape_cast %3 : vector<8xf32> to vector<8x1xf32>
    %cst_4 = arith.constant 5.120000e+02 : f32
    %5 = vector.broadcast %cst_4 : f32 to vector<8x1xf32>
    %6 = arith.divf %4, %5 : vector<8x1xf32>
    %7 = vector.broadcast %6 : vector<8x1xf32> to vector<8x512xf32>
    %8 = arith.subf %2, %7 : vector<8x512xf32>
    %9 = arith.mulf %8, %8 : vector<8x512xf32>
    %cst_5 = arith.constant dense<0.000000e+00> : vector<8xf32>
    %10 = vector.multi_reduction <add>, %9, %cst_5 [1] : vector<8x512xf32> to vector<8xf32>
    %11 = vector.shape_cast %10 : vector<8xf32> to vector<8x1xf32>
    %cst_6 = arith.constant 5.120000e+02 : f32
    %12 = vector.broadcast %cst_6 : f32 to vector<8x1xf32>
    %13 = arith.divf %11, %12 : vector<8x1xf32>
    %cst_7 = arith.constant 9.99999974E-6 : f32
    %14 = vector.broadcast %cst_7 : f32 to vector<8x1xf32>
    %15 = arith.addf %13, %14 : vector<8x1xf32>
    %16 = math.rsqrt %15 : vector<8x1xf32>
    %17 = vector.broadcast %16 : vector<8x1xf32> to vector<8x512xf32>
    %18 = arith.mulf %8, %17 : vector<8x512xf32>
    %c0_8 = arith.constant 0 : index
    %c0_9 = arith.constant 0 : index
    %19 = vector.load %arg3[%c0_8, %c0_9] : memref<8x1xf32, #tpu.memory_space<vmem>>, vector<8x1xf32>
    %20 = vector.broadcast %19 : vector<8x1xf32> to vector<8x512xf32>
    %21 = arith.mulf %18, %20 : vector<8x512xf32>
    %c0_10 = arith.constant 0 : index
    %c0_11 = arith.constant 0 : index
    %22 = vector.load %arg4[%c0_10, %c0_11] : memref<8x1xf32, #tpu.memory_space<vmem>>, vector<8x1xf32>
    %23 = vector.broadcast %22 : vector<8x1xf32> to vector<8x512xf32>
    %24 = arith.addf %21, %23 : vector<8x512xf32>
    %cst_12 = arith.constant 0.000000e+00 : f32
    %25 = vector.broadcast %cst_12 : f32 to vector<8x512xf32>
    %26 = arith.maximumf %24, %25 : vector<8x512xf32>
    %27 = vector.extract_strided_slice %26 {offsets = [0, 0], sizes = [8, 256], strides = [1, 1]} : vector<8x512xf32> to vector<8x256xf32>
    %c0_13 = arith.constant 0 : index
    %c0_14 = arith.constant 0 : index
    %c0_15 = arith.constant 0 : index
    %28 = vector.load %arg8[%c0_13, %c0_14, %c0_15] : memref<8x2x256xf32, #tpu.memory_space<vmem>>, vector<8x1x256xf32>
    %29 = vector.shape_cast %28 : vector<8x1x256xf32> to vector<8x256xf32>
    %30 = vector.shape_cast %27 : vector<8x256xf32> to vector<8x1x256xf32>
    tpu.vector_store %arg8[%c0_13, %c0_14, %c0_15], %30 {strides = array<i32>} : memref<8x2x256xf32, #tpu.memory_space<vmem>>, vector<8x1x256xf32>,
    %31 = vector.extract_strided_slice %26 {offsets = [0, 256], sizes = [8, 256], strides = [1, 1]} : vector<8x512xf32> to vector<8x256xf32>
    %c0_16 = arith.constant 0 : index
    %c1 = arith.constant 1 : index
    %c0_17 = arith.constant 0 : index
    %32 = vector.load %arg8[%c0_16, %c1, %c0_17] : memref<8x2x256xf32, #tpu.memory_space<vmem>>, vector<8x1x256xf32>
    %33 = vector.shape_cast %32 : vector<8x1x256xf32> to vector<8x256xf32>
    %34 = vector.shape_cast %31 : vector<8x256xf32> to vector<8x1x256xf32>
    tpu.vector_store %arg8[%c0_16, %c1, %c0_17], %34 {strides = array<i32>} : memref<8x2x256xf32, #tpu.memory_space<vmem>>, vector<8x1x256xf32>,
    %c0_18 = arith.constant 0 : index
    %c0_19 = arith.constant 0 : index
    %c0_20 = arith.constant 0 : index
    %35 = vector.load %arg8[%c0_18, %c0_19, %c0_20] : memref<8x2x256xf32, #tpu.memory_space<vmem>>, vector<8x2x256xf32>
    %36 = arith.truncf %35 : vector<8x2x256xf32> to vector<8x2x256xbf16>
    %c0_21 = arith.constant 0 : index
    %c0_22 = arith.constant 0 : index
    %c0_23 = arith.constant 0 : index
    %37 = vector.load %arg5[%c0_21, %c0_22, %c0_23] : memref<8x10x256xbf16, #tpu.memory_space<vmem>>, vector<8x10x256xbf16>
    %cst_24 = arith.constant dense<0.000000e+00> : vector<8x2x10xf32>
    %38 = tpu.matmul %36, %37, %cst_24 {dimension_numbers = #tpu.dot_dimension_numbers<[2], [2], [1], [1], [0, 0, 0, 1, 1, 1], [0], [0]>} : vector<8x2x256xbf16>, vector<8x10x256xbf16>, vector<8x2x10xf32> -> vector<8x2x10xf32>
    %cst_25 = arith.constant dense<0.000000e+00> : vector<2x10xf32>
    %39 = vector.multi_reduction <add>, %38, %cst_25 [0] : vector<8x2x10xf32> to vector<2x10xf32>
    %c0_26 = arith.constant 0 : index
    %c0_27 = arith.constant 0 : index
    %40 = vector.load %arg6[%c0_26, %c0_27] : memref<1x10xf32, #tpu.memory_space<vmem>>, vector<1x10xf32>
    %41 = vector.broadcast %40 : vector<1x10xf32> to vector<2x10xf32>
    %42 = arith.addf %39, %41 : vector<2x10xf32>
    %c0_28 = arith.constant 0 : index
    %c0_29 = arith.constant 0 : index
    %43 = vector.load %arg7[%c0_28, %c0_29] : memref<2x10xf32, #tpu.memory_space<vmem>>, vector<2x10xf32>
    tpu.vector_store %arg7[%c0_28, %c0_29], %42 {strides = array<i32>} : memref<2x10xf32, #tpu.memory_space<vmem>>, vector<2x10xf32>,
    return
  }
  func.func @transform_0(%arg0: i32) -> (i32, i32) {
    %c0_i32 = arith.constant 0 : i32
    %c0_i32_0 = arith.constant 0 : i32
    %c0_i32_1 = arith.constant 0 : i32
    return %c0_i32, %c0_i32_0 : i32, i32
  }
  func.func @transform_1(%arg0: i32) -> (i32, i32) {
    %c0_i32 = arith.constant 0 : i32
    %c0_i32_0 = arith.constant 0 : i32
    %c0_i32_1 = arith.constant 0 : i32
    return %c0_i32, %c0_i32_0 : i32, i32
  }
  func.func @transform_2(%arg0: i32) -> (i32, i32) {
    %c0_i32 = arith.constant 0 : i32
    %c0_i32_0 = arith.constant 0 : i32
    %c0_i32_1 = arith.constant 0 : i32
    return %c0_i32, %c0_i32_0 : i32, i32
  }
  func.func @transform_3(%arg0: i32) -> (i32, i32) {
    %c0_i32 = arith.constant 0 : i32
    %c0_i32_0 = arith.constant 0 : i32
    %c0_i32_1 = arith.constant 0 : i32
    return %c0_i32, %c0_i32_0 : i32, i32
  }
  func.func @transform_4(%arg0: i32) -> (i32, i32, i32) {
    %c0_i32 = arith.constant 0 : i32
    %c0_i32_0 = arith.constant 0 : i32
    %c0_i32_1 = arith.constant 0 : i32
    %c0_i32_2 = arith.constant 0 : i32
    return %c0_i32, %c0_i32_0, %c0_i32_1 : i32, i32, i32
  }
  func.func @transform_5(%arg0: i32) -> (i32, i32) {
    %c0_i32 = arith.constant 0 : i32
    %c0_i32_0 = arith.constant 0 : i32
    %c0_i32_1 = arith.constant 0 : i32
    return %c0_i32, %c0_i32_0 : i32, i32
  }
  func.func @transform_6(%arg0: i32) -> (i32, i32) {
    %c0_i32 = arith.constant 0 : i32
    %c0_i32_0 = arith.constant 0 : i32
    %c0_i32_1 = arith.constant 0 : i32
    return %c0_i32, %c0_i32_0 : i32, i32
  }
}

</mosaic_0001>

<bundles_post_ra>
// kernel: _meta_forward_impl.1
= control target key start
LH: loop header
LB: loop body
LE: loop exit
PB: predicated region body
PF: predicated region fallthrough
CT: control target
= control target key end

     0   :  { %vm90_vm0 = vcmask 1041408   ;;  %s1207_s0 = inlined_call_operand.vmem [shape: bf16[36,512], index: 0, kind: input, shape index: {}]   ;;  %s1208_s1 = inlined_call_operand.vmem [shape: bf16[8,36], index: 1, kind: input, shape index: {}]   ;;  %s1209_s2 = inlined_call_operand.vmem [shape: f32[8,1], index: 2, kind: input, shape index: {}]   ;;  %s1210_s3 = inlined_call_operand.vmem [shape: f32[8,1], index: 3, kind: input, shape index: {}]   ;;  %s1211_s4 = inlined_call_operand.vmem [shape: bf16[8,10,256], index: 4, kind: input, shape index: {}]   ;;  %s1212_s5 = inlined_call_operand.vmem [shape: f32[1,10], index: 5, kind: input, shape index: {}]   ;;  %s1213_s6 = inlined_call_operand.hbm [shape: f32[2,10], index: 6, kind: output, shape index: {}]  }
   0x1   :  { %v34_v0 = vld [vmem:[%s1207_s0 + $0x40] sm:$0x33]  ;;  %v35_v1 = vld [vmem:[%s1207_s0 + $0x48] sm:$0x33]  ;;  %v885_v7 = vld [vmem:[%s1207_s0 + $0x2c] sm:$0xf0] }
   0x2   :  { %v62_v2 = vunpack.c.l.b16 %v34_v0  ;;  %v63_v3 = vunpack.c.h.b16 %v34_v0  ;;  %v64_v4 = vunpack.c.l.b16 %v35_v1  ;;  %v65_v5 = vunpack.c.h.b16 %v35_v1  ;;  %v797_v6 = vld [vmem:[%s1207_s0 + $0x20] sm:$0xf]  ;;  %v883_v12 = vld [vmem:[%s1207_s0 + $0x24] sm:$0xf]  ;;  %v799_v13 = vld [vmem:[%s1207_s0 + $0x30] sm:$0xf0] }
   0x3   :  { %v805_v14 = vld [vmem:[%s1207_s0 + $0x28] sm:$0xf]  ;;  %v886_v15 = vld [vmem:[%s1207_s0 + $0x34] sm:$0xf0]  ;;  %v884_v16 = vld [vmem:[%s1207_s0 + $0x2c] sm:$0xf]  ;;  %v798_v23 = vor.u32 %v885_v7, %v797_v6  ;;  %v802_v24 = vor.u32 %v883_v12, %v799_v13 }
   0x4   :  { %v74_v8 = vpack.c.b16 %v62_v2, %v62_v2  ;;  %v75_v9 = vpack.c.b16 %v63_v3, %v63_v3  ;;  %v76_v10 = vpack.c.b16 %v64_v4, %v64_v4  ;;  %v77_v11 = vpack.c.b16 %v65_v5, %v65_v5  ;;  %v807_v17 = vld [vmem:[%s1207_s0 + $0x38] sm:$0xf0]  ;;  %v781_v22 = vld [vmem:[%s1207_s0] sm:$0xf]  ;;  %v881_v25 = vld [vmem:[%s1207_s0 + $0xc] sm:$0xf0] }
   0x5   :  { %v879_v26 = vld [vmem:[%s1207_s0 + $0x4] sm:$0xf]  ;;  %v783_v27 = vld [vmem:[%s1207_s0 + $0x10] sm:$0xf0]  ;;  %v806_v28 = vor.u32 %v886_v15, %v805_v14  ;;  %v810_v29 = vor.u32 %v884_v16, %v807_v17  ;;  %v789_v30 = vld [vmem:[%s1207_s0 + $0x8] sm:$0xf] }
   0x6   :  { %v92_v18 = vsel %vm90_vm0, %v74_v8, 0  ;;  %v95_v19 = vsel %vm90_vm0, %v75_v9, 0  ;;  %v98_v20 = vsel %vm90_vm0, %v76_v10, 0  ;;  %v101_v21 = vsel %vm90_vm0, %v77_v11, 0 }
   0x7   :  { %108 = vmatpush.bf16.msra.mxu0 %v92_v18  ;;  %121 = vmatpush.bf16.msra.mxu1 %v95_v19 }
   0x8   :  { %134 = vmatpush.bf16.msra.mxu2 %v98_v20  ;;  %147 = vmatpush.bf16.msra.mxu3 %v101_v21 }
   0x9   :  { %11 = vsyncpa [#allocation4], 0  ;;  %v882_v31 = vld [vmem:[%s1207_s0 + $0x14] sm:$0xf0]  ;;  %v880_v32 = vld [vmem:[%s1207_s0 + $0xc] sm:$0xf]  ;;  %v782_v34 = vor.u32 %v881_v25, %v781_v22  ;;  %v786_v35 = vor.u32 %v879_v26, %v783_v27 }
   0xa   :  { %v791_v33 = vld [vmem:[%s1207_s0 + $0x18] sm:$0xf0]  ;;  %v790_v36 = vor.u32 %v882_v31, %v789_v30  ;;  %v25_v38 = vld [vmem:[%s1208_s1] sm:$0xf]  ;;  %vm86_vm1 = vcmask 293888   ;;  %v939_v50 = vmov 512.0  }
   0xb   :  { %109 = vmatpush.bf16.msra.mxu0 %v798_v23  ;;  %122 = vmatpush.bf16.msra.mxu1 %v802_v24  ;;  %v794_v37 = vor.u32 %v880_v32, %v791_v33  ;;  %909 = vrcp.f32 %v939_v50  ;;  %v197_v52 = vld [vmem:[%s1209_s2] sm:$0xff]  ;;  %v940_v54 = vmov 0   ;;  %v825_v18 = vld [vmem:[%s1211_s4 + $0x10] sm:$0xf]  ;;  %v890_v19 = vld [vmem:[%s1211_s4 + $0x14] sm:$0x10] }
   0xc   :  { %135 = vmatpush.bf16.msra.mxu2 %v806_v28  ;;  %148 = vmatpush.bf16.msra.mxu3 %v810_v29  ;;  %v207_v56 = vld [vmem:[%s1210_s3] sm:$0xff]  ;;  %v826_v20 = vor.u32 %v890_v19, %v825_v18  ;;  %v889_v21 = vld [vmem:[%s1211_s4 + $0x14] sm:$0xf]  ;;  %v827_v22 = vld [vmem:[%s1211_s4 + $0x18] sm:$0x10]  ;;  %vm224_vm6 = vcmask 1040384  }
   0xd   :  { %906 = vset.pattern.permute.xlu1 %v940_v54  ;;  %907 = vset.pattern.permute.xlu0 %v940_v54  ;;  %v817_v23 = vld [vmem:[%s1211_s4] sm:$0xf]  ;;  %v830_v25 = vor.u32 %v889_v21, %v827_v22  ;;  %v888_v26 = vld [vmem:[%s1211_s4 + $0x4] sm:$0x10]  ;;  %v887_v27 = vld [vmem:[%s1211_s4 + $0x4] sm:$0xf] }
   0xe   :  { %200 = vperm.xlu1 %906, %v197_v52   ;;  %v819_v28 = vld [vmem:[%s1211_s4 + $0x8] sm:$0x10]  ;;  %v818_v29 = vor.u32 %v888_v26, %v817_v23  ;;  %vm226_vm7 = vcmask 1041409   ;;  %vm229_vm8 = vcmask 1042434   ;;  %vm232_vm9 = vcmask 1043459   ;;  %s941_s20 = smov [#allocation3]  }
   0xf   :  { %110 = vmatpush.bf16.msra.mxu0 %v782_v34  ;;  %123 = vmatpush.bf16.msra.mxu1 %v786_v35  ;;  %v822_v30 = vor.u32 %v887_v27, %v819_v28  ;;  %vm235_vm10 = vcmask 1044484   ;;  %vm238_vm11 = vcmask 1045509   ;;  %vm241_vm13 = vcmask 1046534   ;;  %v892_v23 = vld [vmem:[%s1211_s4 + $0x24] sm:$0x10]  ;;  %s768_s21 = sshll.u32 %s941_s20, 4  ;;  %s769_s21 = int_to_ptr.vmem [resolvable:$true] %s768_s21 }
  0x10   :  { %136 = vmatpush.bf16.msra.mxu2 %v790_v36  ;;  %149 = vmatpush.bf16.msra.mxu3 %v794_v37  ;;  %vm244_vm14 = vcmask 1046528   ;;  %v891_v26 = vld [vmem:[%s1211_s4 + $0x24] sm:$0xf]  ;;  %v835_v28 = vld [vmem:[%s1211_s4 + $0x28] sm:$0x10]  ;;  %vm741_vm15 = vcmask 74752  }
  0x11   :  { %v910_v51 = vpop.eup %909  ;;  %s770_s24 = sshll.u32 %s1213_s6, 4  ;;  %s771_s24 = int_to_ptr.hbm [resolvable:$true] %s770_s24 }
  0x12   :  { %811 = vmatmul.msk.bf16.vlgmr.msra.gmra.mxu0 %vm86_vm1, %v25_v38  ;;  %812 = vmatmul.msk.bf16.vlgmr.msra.gmra.mxu1 %vm86_vm1, %v25_v38  ;;  %v161_v53 = vmul.f32 512.0, %v910_v51  ;;  %vm165_vm2 = vweird.f32 %v910_v51 }
  0x13   :  { %813 = vmatmul.msk.bf16.vlgmr.msra.gmra.mxu2 %vm86_vm1, %v25_v38  ;;  %814 = vmatmul.msk.bf16.vlgmr.msra.gmra.mxu3 %vm86_vm1, %v25_v38 }
  0x14   :  { %v162_v55 = vsub.f32 1.0, %v161_v53  ;;  %464 = vmatpush.bf16.xpose.msrb.mxu2 %v826_v20  ;;  %477 = vmatpush.bf16.xpose.msrb.mxu3 %v830_v25  ;;  %v833_v20 = vld [vmem:[%s1211_s4 + $0x20] sm:$0xf] }
  0x15   :  { %421 = vmatpush.bf16.xpose.msrb.mxu0 %v818_v29  ;;  %434 = vmatpush.bf16.xpose.msrb.mxu1 %v822_v30  ;;  %v834_v25 = vor.u32 %v892_v23, %v833_v20  ;;  %v838_v30 = vor.u32 %v891_v26, %v835_v28 }
  0x16   :  { %v163_v57 = vmul.f32 %v910_v51, %v162_v55  ;;  %210 = vperm.xlu1 %906, %v207_v56  }
  0x18   :  { %v164_v58 = vadd.f32 %v910_v51, %v163_v57 }
  0x1a   :  { %v166_v59 = vsel %vm165_vm2, %v910_v51, %v164_v58 }
  0x1d   :  { %507 = vmatpush.bf16.xpose.msra.mxu0 %v834_v25  ;;  %520 = vmatpush.bf16.xpose.msra.mxu1 %v838_v30 }
  0x80   :  { %v201_v16 = vpop.permute.xlu1 %200 }
  0x8f   :  { %v112_v39 = vpop.f32.mrf.mxu0  ;;  %v125_v40 = vpop.f32.mrf.mxu1 }
  0x90   :  { %v155_v41 = vadd.f32 %v125_v40, %v112_v39 }
  0x96   :  { %v138_v42 = vpop.f32.mrf.mxu2  ;;  %v151_v43 = vpop.f32.mrf.mxu3 }
  0x97   :  { %v156_v44 = vadd.f32 %v155_v41, %v138_v42  ;;  %v114_v45 = vpop.f32.mrf.mxu0  ;;  %v127_v46 = vpop.f32.mrf.mxu1  ;;  %v255_v41 = vlaneseq }
  0x99   :  { %v157_v47 = vadd.f32 %v156_v44, %v151_v43  ;;  %vm1068_vm12 = vcmp.lt.s32.totalorder %v255_v41, 256 }
  0x9b   :  { %158 = vadd.xlane.f32.xlu0 %v157_v47 }
  0x9e   :  { %v140_v48 = vpop.f32.mrf.mxu2  ;;  %v153_v49 = vpop.f32.mrf.mxu3 }
 0x10e   :  { %v159_v60 = vpop.xlane.xlu0 %158 }
 0x10f   :  { %v167_v61 = vmul.f32 %v166_v59, %v159_v60 }
 0x111   :  { %v168_v62 = vsub.f32 %v112_v39, %v167_v61  ;;  %v169_v63 = vsub.f32 %v125_v40, %v167_v61  ;;  %v170_v0 = vsub.f32 %v138_v42, %v167_v61  ;;  %v171_v1 = vsub.f32 %v151_v43, %v167_v61  ;;  %v211_v40 = vpop.permute.xlu1 %210 }
 0x113   :  { %v172_v2 = vmul.f32 %v168_v62, %v168_v62  ;;  %v173_v3 = vmul.f32 %v169_v63, %v169_v63  ;;  %v174_v4 = vmul.f32 %v170_v0, %v170_v0  ;;  %v175_v6 = vmul.f32 %v171_v1, %v171_v1 }
 0x115   :  { %v176_v5 = vadd.f32 %v173_v3, %v172_v2  ;;  %v841_v2 = vld [vmem:[%s1211_s4 + $0x30] sm:$0xf] }
 0x117   :  { %v177_v7 = vadd.f32 %v176_v5, %v174_v4  ;;  %v894_v5 = vld [vmem:[%s1211_s4 + $0x34] sm:$0x10] }
 0x119   :  { %v178_v8 = vadd.f32 %v177_v7, %v175_v6 }
 0x11b   :  { %179 = vadd.xlane.f32.xlu0 %v178_v8 }
 0x18e   :  { %v180_v9 = vpop.xlane.xlu0 %179 }
 0x18f   :  { %v181_v10 = vmul.f32 %v180_v9, %v166_v59  ;;  %v893_v9 = vld [vmem:[%s1211_s4 + $0x34] sm:$0xf] }
 0x191   :  { %v182_v11 = vadd.f32 1e-05, %v181_v10 }
 0x193   :  { %911 = vrsqrt.f32 %v182_v11  ;;  %vm189_vm4 = vweird.f32 %v182_v11 }
 0x199   :  { %v912_v12 = vpop.eup %911 }
 0x19a   :  { %v184_v13 = vmul.f32 %v912_v12, %v182_v11  ;;  %vm190_vm3 = vweird.f32 %v912_v12 }
 0x19b   :  { %vm191_vm5 = vmor %vm189_vm4, %vm190_vm3 }
 0x19c   :  { %v185_v14 = vmul.f32 %v912_v12, %v184_v13  ;;  %v842_v13 = vor.u32 %v894_v5, %v841_v2 }
 0x19e   :  { %v186_v15 = vmul.f32 0.5, %v185_v14  ;;  %550 = vmatpush.bf16.xpose.msra.mxu2 %v842_v13  ;;  %v873_v13 = vld [vmem:[%s1211_s4 + $0x70] sm:$0xf] }
 0x1a0   :  { %v187_v17 = vsub.f32 1.5, %v186_v15 }
 0x1a2   :  { %v188_v24 = vmul.f32 %v912_v12, %v187_v17 }
 0x1a4   :  { %v192_v31 = vsel %vm191_vm5, %v912_v12, %v188_v24 }
 0x1a5   :  { %v193_v32 = vmul.f32 %v192_v31, %v168_v62  ;;  %v194_v33 = vmul.f32 %v192_v31, %v169_v63  ;;  %v195_v34 = vmul.f32 %v192_v31, %v170_v0  ;;  %v196_v35 = vmul.f32 %v192_v31, %v171_v1 }
 0x1a7   :  { %v203_v36 = vmul.f32 %v201_v16, %v193_v32  ;;  %v204_v37 = vmul.f32 %v201_v16, %v194_v33  ;;  %v205_v38 = vmul.f32 %v201_v16, %v195_v34  ;;  %v206_v39 = vmul.f32 %v201_v16, %v196_v35  ;;  %v843_v16 = vld [vmem:[%s1211_s4 + $0x38] sm:$0x10]  ;;  %v849_v34 = vld [vmem:[%s1211_s4 + $0x40] sm:$0xf]  ;;  %v896_v35 = vld [vmem:[%s1211_s4 + $0x44] sm:$0x10] }
 0x1a8   :  { %v846_v19 = vor.u32 %v893_v9, %v843_v16  ;;  %v867_v16 = vld [vmem:[%s1211_s4 + $0x68] sm:$0x10] }
 0x1a9   :  { %v213_v42 = vadd.f32 %v211_v40, %v203_v36  ;;  %v214_v43 = vadd.f32 %v211_v40, %v204_v37  ;;  %v216_v44 = vadd.f32 %v211_v40, %v206_v39  ;;  %v215_v45 = vadd.f32 %v211_v40, %v205_v38  ;;  %v895_v36 = vld [vmem:[%s1211_s4 + $0x44] sm:$0xf]  ;;  %v851_v37 = vld [vmem:[%s1211_s4 + $0x48] sm:$0x10] }
 0x1aa   :  { %563 = vmatpush.bf16.xpose.msra.mxu3 %v846_v19 }
 0x1ab   :  { %v218_v46 = vmax.f32 %v214_v43, 0.0  ;;  %v220_v47 = vmax.f32 %v216_v44, 0.0  ;;  %v217_v49 = vmax.f32 %v213_v42, 0.0  ;;  %v219_v51 = vmax.f32 %v215_v45, 0.0  ;;  %v857_v42 = vld [vmem:[%s1211_s4 + $0x50] sm:$0xf] }
 0x1ac   :  { %v898_v43 = vld [vmem:[%s1211_s4 + $0x54] sm:$0x10] }
 0x1ad   :  { %v223_v50 = vrot.slane %v218_v46, 7  ;;  %v276_v52 = vrot.slane %v220_v47, 7 }
 0x1af   :  { %v225_v53 = vsel %vm224_vm6, %v217_v49, %v223_v50  ;;  %v227_v54 = vsel %vm226_vm7, %v217_v49, %v223_v50  ;;  %v230_v55 = vsel %vm229_vm8, %v217_v49, %v223_v50  ;;  %v233_v56 = vsel %vm232_vm9, %v217_v49, %v223_v50 }
 0x1b0   :  { %v228_v57 = vrot.slane %v227_v54, 1  ;;  %v231_v58 = vrot.slane %v230_v55, 2  ;;  %v234_v59 = vrot.slane %v233_v56, 3  ;;  %v236_v60 = vsel %vm235_vm10, %v217_v49, %v223_v50  ;;  %259 = vst.msk [vmem:[#allocation2] ss:$2 sm:$0x3] %vm1068_vm12, %v225_v53 }
 0x1b1   :  { %v237_v61 = vrot.slane %v236_v60, 4  ;;  %v239_v62 = vsel %vm238_vm11, %v217_v49, %v223_v50  ;;  %v242_v63 = vsel %vm241_vm13, %v217_v49, %v223_v50  ;;  %v245_v0 = vsel %vm244_vm14, %v223_v50, %v217_v49  ;;  %v897_v49 = vld [vmem:[%s1211_s4 + $0x54] sm:$0xf]  ;;  %v859_v50 = vld [vmem:[%s1211_s4 + $0x58] sm:$0x10] }
 0x1b2   :  { %v240_v1 = vrot.slane %v239_v62, 5  ;;  %261 = vst.msk [vmem:[#allocation2 + $0x4] ss:$2 sm:$0x3] %vm1068_vm12, %v228_v57  ;;  %v243_v3 = vrot.slane %v242_v63, 6  ;;  %v278_v4 = vsel %vm226_vm7, %v219_v51, %v276_v52  ;;  %v246_v6 = vrot.slane %v245_v0, 7 }
 0x1b3   :  { %263 = vst.msk [vmem:[#allocation2 + $0x8] ss:$2 sm:$0x3] %vm1068_vm12, %v231_v58  ;;  %v280_v7 = vsel %vm229_vm8, %v219_v51, %v276_v52  ;;  %v282_v8 = vsel %vm232_vm9, %v219_v51, %v276_v52  ;;  %v277_v10 = vsel %vm224_vm6, %v219_v51, %v276_v52  ;;  %v279_v11 = vrot.slane %v278_v4, 1 }
 0x1b4   :  { %265 = vst.msk [vmem:[#allocation2 + $0xc] ss:$2 sm:$0x3] %vm1068_vm12, %v234_v59  ;;  %v284_v12 = vsel %vm235_vm10, %v219_v51, %v276_v52  ;;  %v281_v14 = vrot.slane %v280_v7, 2  ;;  %v286_v15 = vsel %vm238_vm11, %v219_v51, %v276_v52  ;;  %v283_v17 = vrot.slane %v282_v8, 3 }
 0x1b5   :  { %267 = vst.msk [vmem:[#allocation2 + $0x10] ss:$2 sm:$0x3] %vm1068_vm12, %v237_v61  ;;  %v288_v18 = vsel %vm241_vm13, %v219_v51, %v276_v52  ;;  %v285_v21 = vrot.slane %v284_v12, 4  ;;  %v290_v22 = vsel %vm244_vm14, %v276_v52, %v219_v51  ;;  %v287_v24 = vrot.slane %v286_v15, 5 }
 0x1b6   :  { %269 = vst.msk [vmem:[#allocation2 + $0x14] ss:$2 sm:$0x3] %vm1068_vm12, %v240_v1  ;;  %v289_v27 = vrot.slane %v288_v18, 6  ;;  %v291_v29 = vrot.slane %v290_v22, 7  ;;  %v850_v51 = vor.u32 %v896_v35, %v849_v34  ;;  %v854_v52 = vor.u32 %v895_v36, %v851_v37 }
 0x1b7   :  { %271 = vst.msk [vmem:[#allocation2 + $0x18] ss:$2 sm:$0x3] %vm1068_vm12, %v243_v3  ;;  %v858_v57 = vor.u32 %v898_v43, %v857_v42  ;;  %v862_v58 = vor.u32 %v897_v49, %v859_v50  ;;  %v900_v7 = vld [vmem:[%s1211_s4 + $0x64] sm:$0x10] }
 0x1b8   :  { %273 = vst.msk [vmem:[#allocation2 + $0x1c] ss:$2 sm:$0x3] %vm1068_vm12, %v246_v6  ;;  %v865_v6 = vld [vmem:[%s1211_s4 + $0x60] sm:$0xf] }
 0x1b9   :  { %301 = vst.msk [vmem:[#allocation2 + $0x1] ss:$2 sm:$0x3] %vm1068_vm12, %v277_v10  ;;  %v899_v15 = vld [vmem:[%s1211_s4 + $0x64] sm:$0xf]  ;;  %v866_v23 = vor.u32 %v900_v7, %v865_v6 }
 0x1ba   :  { %303 = vst.msk [vmem:[#allocation2 + $0x5] ss:$2 sm:$0x3] %vm1068_vm12, %v279_v11  ;;  %v875_v22 = vld [vmem:[%s1211_s4 + $0x78] sm:$0x10] }
 0x1bb   :  { %305 = vst.msk [vmem:[#allocation2 + $0x9] ss:$2 sm:$0x3] %vm1068_vm12, %v281_v14  ;;  %v902_v14 = vld [vmem:[%s1211_s4 + $0x74] sm:$0x10] }
 0x1bc   :  { %307 = vst.msk [vmem:[#allocation2 + $0xd] ss:$2 sm:$0x3] %vm1068_vm12, %v283_v17 }
 0x1bd   :  { %309 = vst.msk [vmem:[#allocation2 + $0x11] ss:$2 sm:$0x3] %vm1068_vm12, %v285_v21  ;;  %v901_v21 = vld [vmem:[%s1211_s4 + $0x74] sm:$0xf] }
 0x1be   :  { %311 = vst.msk [vmem:[#allocation2 + $0x15] ss:$2 sm:$0x3] %vm1068_vm12, %v287_v24  ;;  %v870_v24 = vor.u32 %v899_v15, %v867_v16  ;;  %v878_v28 = vor.u32 %v901_v21, %v875_v22 }
 0x1bf   :  { %313 = vst.msk [vmem:[#allocation2 + $0x19] ss:$2 sm:$0x3] %vm1068_vm12, %v289_v27  ;;  %v874_v27 = vor.u32 %v902_v14, %v873_v13 }
 0x1c0   :  { %315 = vst.msk [vmem:[#allocation2 + $0x1d] ss:$2 sm:$0x3] %vm1068_vm12, %v291_v29  ;;  %v316_v31 = vld [vmem:[#allocation2] sm:$0xf] }
 0x1c1   :  { %332 = vst [vmem:[#allocation1] ss:$4 sm:$0xff] %v316_v31  ;;  %v317_v32 = vld [vmem:[#allocation2 + $0x4] sm:$0xf] }
 0x1c2   :  { %336 = vst [vmem:[#allocation1 + $0x20] ss:$4 sm:$0xff] %v317_v32  ;;  %v318_v33 = vld [vmem:[#allocation2 + $0x8] sm:$0xf] }
 0x1c3   :  { %v319_v44 = vld [vmem:[#allocation2 + $0xc] sm:$0xf] }
 0x1c4   :  { %v320_v61 = vld [vmem:[#allocation2 + $0x10] sm:$0xf] }
 0x1c5   :  { %v321_v0 = vld [vmem:[#allocation2 + $0x14] sm:$0xf] }
 0x1c6   :  { %v322_v5 = vld [vmem:[#allocation2 + $0x18] sm:$0xf] }
 0x1c7   :  { %v323_v10 = vld [vmem:[#allocation2 + $0x1c] sm:$0xf] }
 0x1c8   :  { %v333_v38 = vld.sshfl [vmem:[#allocation1] sm:$0xff pattern:$0x73625140]  ;;  %v334_v39 = vld.sshfl [vmem:[#allocation1 + $0x8] sm:$0xff pattern:$0x73625140] }
 0x1c9   :  { %339 = vst [vmem:[#allocation1] ss:$4 sm:$0xff] %v318_v33  ;;  %v373_v40 = vpack.c.bf16 %v334_v39, %v333_v38  ;;  %v337_v41 = vld.sshfl [vmem:[#allocation1 + $0x20] sm:$0xff pattern:$0x73625140] }
 0x1ca   :  { %v338_v45 = vld.sshfl [vmem:[#allocation1 + $0x28] sm:$0xff pattern:$0x73625140] }
 0x1cb   :  { %v398_v46 = vunpack.c.l.b16 %v373_v40  ;;  %v399_v47 = vunpack.c.h.b16 %v373_v40  ;;  %342 = vst [vmem:[#allocation1 + $0x20] ss:$4 sm:$0xff] %v319_v44  ;;  %v374_v48 = vpack.c.bf16 %v338_v45, %v337_v41 }
 0x1cd   :  { %v400_v53 = vpack.c.b16 %v398_v46, %v398_v46  ;;  %v401_v54 = vpack.c.b16 %v399_v47, %v399_v47  ;;  %v441_v55 = vunpack.c.l.b16 %v374_v48  ;;  %v442_v56 = vunpack.c.h.b16 %v374_v48 }
 0x1cf   :  { %422 = vmatmul.bf16.vlgmr.msrb.gmra.mxu0 %v400_v53  ;;  %435 = vmatmul.bf16.vlgmr.msrb.gmra.mxu1 %v401_v54  ;;  %v443_v59 = vpack.c.b16 %v441_v55, %v441_v55  ;;  %v444_v60 = vpack.c.b16 %v442_v56, %v442_v56 }
 0x1d0   :  { %v340_v62 = vld.sshfl [vmem:[#allocation1] sm:$0xff pattern:$0x73625140]  ;;  %v341_v63 = vld.sshfl [vmem:[#allocation1 + $0x8] sm:$0xff pattern:$0x73625140]  ;;  %593 = vmatpush.bf16.xpose.msrb.mxu0 %v850_v51  ;;  %606 = vmatpush.bf16.xpose.msrb.mxu1 %v854_v52 }
 0x1d1   :  { %465 = vmatmul.bf16.vlgmr.msrb.gmra.mxu2 %v443_v59  ;;  %478 = vmatmul.bf16.vlgmr.msrb.gmra.mxu3 %v444_v60  ;;  %345 = vst [vmem:[#allocation1] ss:$4 sm:$0xff] %v320_v61  ;;  %v375_v3 = vpack.c.bf16 %v341_v63, %v340_v62 }
 0x1d2   :  { %v343_v1 = vld.sshfl [vmem:[#allocation1 + $0x20] sm:$0xff pattern:$0x73625140]  ;;  %v344_v2 = vld.sshfl [vmem:[#allocation1 + $0x28] sm:$0xff pattern:$0x73625140]  ;;  %636 = vmatpush.bf16.xpose.msrb.mxu2 %v858_v57  ;;  %649 = vmatpush.bf16.xpose.msrb.mxu3 %v862_v58 }
 0x1d3   :  { %348 = vst [vmem:[#allocation1 + $0x20] ss:$4 sm:$0xff] %v321_v0  ;;  %v376_v4 = vpack.c.bf16 %v344_v2, %v343_v1  ;;  %v484_v11 = vunpack.c.l.b16 %v375_v3  ;;  %v485_v12 = vunpack.c.h.b16 %v375_v3 }
 0x1d5   :  { %v527_v19 = vunpack.c.l.b16 %v376_v4  ;;  %v528_v20 = vunpack.c.h.b16 %v376_v4  ;;  %v486_v25 = vpack.c.b16 %v484_v11, %v484_v11  ;;  %v487_v26 = vpack.c.b16 %v485_v12, %v485_v12 }
 0x1d7   :  { %v529_v29 = vpack.c.b16 %v527_v19, %v527_v19  ;;  %v530_v30 = vpack.c.b16 %v528_v20, %v528_v20 }
 0x1d8   :  { %v346_v8 = vld.sshfl [vmem:[#allocation1] sm:$0xff pattern:$0x73625140]  ;;  %v347_v9 = vld.sshfl [vmem:[#allocation1 + $0x8] sm:$0xff pattern:$0x73625140] }
 0x1d9   :  { %351 = vst [vmem:[#allocation1] ss:$4 sm:$0xff] %v322_v5  ;;  %v377_v31 = vpack.c.bf16 %v347_v9, %v346_v8 }
 0x1da   :  { %v349_v17 = vld.sshfl [vmem:[#allocation1 + $0x20] sm:$0xff pattern:$0x73625140]  ;;  %v350_v18 = vld.sshfl [vmem:[#allocation1 + $0x28] sm:$0xff pattern:$0x73625140] }
 0x1db   :  { %354 = vst [vmem:[#allocation1 + $0x20] ss:$4 sm:$0xff] %v323_v10  ;;  %v378_v32 = vpack.c.bf16 %v350_v18, %v349_v17  ;;  %v570_v33 = vunpack.c.l.b16 %v377_v31  ;;  %v571_v34 = vunpack.c.h.b16 %v377_v31 }
 0x1dd   :  { %v613_v35 = vunpack.c.l.b16 %v378_v32  ;;  %v614_v36 = vunpack.c.h.b16 %v378_v32  ;;  %v572_v37 = vpack.c.b16 %v570_v33, %v570_v33  ;;  %v573_v38 = vpack.c.b16 %v571_v34, %v571_v34 }
 0x1df   :  { %508 = vmatmul.bf16.vlgmr.msra.gmra.mxu0 %v486_v25  ;;  %521 = vmatmul.bf16.vlgmr.msra.gmra.mxu1 %v487_v26  ;;  %v615_v39 = vpack.c.b16 %v613_v35, %v613_v35  ;;  %v616_v40 = vpack.c.b16 %v614_v36, %v614_v36 }
 0x1e0   :  { %679 = vmatpush.bf16.xpose.msra.mxu0 %v866_v23  ;;  %692 = vmatpush.bf16.xpose.msra.mxu1 %v870_v24  ;;  %v352_v41 = vld.sshfl [vmem:[#allocation1] sm:$0xff pattern:$0x73625140]  ;;  %v353_v42 = vld.sshfl [vmem:[#allocation1 + $0x8] sm:$0xff pattern:$0x73625140] }
 0x1e1   :  { %551 = vmatmul.bf16.vlgmr.msra.gmra.mxu2 %v529_v29  ;;  %564 = vmatmul.bf16.vlgmr.msra.gmra.mxu3 %v530_v30  ;;  %v379_v45 = vpack.c.bf16 %v353_v42, %v352_v41  ;;  %v908_v42 = vld [vmem:[%s1212_s5] ss:$0 sm:$0xff] }
 0x1e2   :  { %722 = vmatpush.bf16.xpose.msra.mxu2 %v874_v27  ;;  %735 = vmatpush.bf16.xpose.msra.mxu3 %v878_v28  ;;  %v355_v43 = vld.sshfl [vmem:[#allocation1 + $0x20] sm:$0xff pattern:$0x73625140]  ;;  %v356_v44 = vld.sshfl [vmem:[#allocation1 + $0x28] sm:$0xff pattern:$0x73625140] }
 0x1e3   :  { %v380_v46 = vpack.c.bf16 %v356_v44, %v355_v43  ;;  %v656_v47 = vunpack.c.l.b16 %v379_v45  ;;  %v657_v48 = vunpack.c.h.b16 %v379_v45 }
 0x1e5   :  { %v699_v49 = vunpack.c.l.b16 %v380_v46  ;;  %v700_v50 = vunpack.c.h.b16 %v380_v46  ;;  %v658_v51 = vpack.c.b16 %v656_v47, %v656_v47  ;;  %v659_v52 = vpack.c.b16 %v657_v48, %v657_v48 }
 0x1e7   :  { %v701_v53 = vpack.c.b16 %v699_v49, %v699_v49  ;;  %v702_v54 = vpack.c.b16 %v700_v50, %v700_v50 }
 0x1ef   :  { %594 = vmatmul.bf16.vlgmr.msrb.gmra.mxu0 %v572_v37  ;;  %607 = vmatmul.bf16.vlgmr.msrb.gmra.mxu1 %v573_v38 }
 0x1f1   :  { %637 = vmatmul.bf16.vlgmr.msrb.gmra.mxu2 %v615_v39  ;;  %650 = vmatmul.bf16.vlgmr.msrb.gmra.mxu3 %v616_v40 }
 0x1ff   :  { %680 = vmatmul.bf16.vlgmr.msra.gmra.mxu0 %v658_v51  ;;  %693 = vmatmul.bf16.vlgmr.msra.gmra.mxu1 %v659_v52 }
 0x201   :  { %723 = vmatmul.bf16.vlgmr.msra.gmra.mxu2 %v701_v53  ;;  %736 = vmatmul.bf16.vlgmr.msra.gmra.mxu3 %v702_v54 }
 0x24c   :  { %v423_v55 = vpop.f32.mrf.mxu0  ;;  %v436_v56 = vpop.f32.mrf.mxu1 }
 0x24d   :  { %v437_v14 = vadd.f32 %v436_v56, %v423_v55 }
 0x24f   :  { %v742_v18 = vsel %vm741_vm15, %v437_v14, 0.0 }
 0x254   :  { %v425_v57 = vpop.f32.mrf.mxu0  ;;  %v438_v58 = vpop.f32.mrf.mxu1 }
 0x255   :  { %v466_v59 = vpop.f32.mrf.mxu2  ;;  %v479_v60 = vpop.f32.mrf.mxu3 }
 0x256   :  { %v480_v13 = vadd.f32 %v479_v60, %v466_v59 }
 0x258   :  { %v743_v16 = vsel %vm741_vm15, %v480_v13, 0.0 }
 0x259   :  { %v744_v23 = vadd.f32 %v743_v16, %v742_v18 }
 0x25c   :  { %v509_v61 = vpop.f32.mrf.mxu0  ;;  %v522_v62 = vpop.f32.mrf.mxu1 }
 0x25d   :  { %v468_v63 = vpop.f32.mrf.mxu2  ;;  %v481_v0 = vpop.f32.mrf.mxu3  ;;  %v523_v15 = vadd.f32 %v522_v62, %v509_v61 }
 0x25f   :  { %v745_v19 = vsel %vm741_vm15, %v523_v15, 0.0 }
 0x260   :  { %v746_v28 = vadd.f32 %v745_v19, %v744_v23 }
 0x264   :  { %v511_v1 = vpop.f32.mrf.mxu0  ;;  %v524_v2 = vpop.f32.mrf.mxu1 }
 0x265   :  { %v552_v3 = vpop.f32.mrf.mxu2  ;;  %v565_v4 = vpop.f32.mrf.mxu3 }
 0x266   :  { %v566_v17 = vadd.f32 %v565_v4, %v552_v3 }
 0x268   :  { %v747_v26 = vsel %vm741_vm15, %v566_v17, 0.0 }
 0x269   :  { %v748_v31 = vadd.f32 %v747_v26, %v746_v28 }
 0x26c   :  { %v595_v5 = vpop.f32.mrf.mxu0  ;;  %v608_v6 = vpop.f32.mrf.mxu1 }
 0x26d   :  { %v554_v7 = vpop.f32.mrf.mxu2  ;;  %v567_v8 = vpop.f32.mrf.mxu3  ;;  %v609_v20 = vadd.f32 %v608_v6, %v595_v5 }
 0x26f   :  { %v749_v29 = vsel %vm741_vm15, %v609_v20, 0.0 }
 0x270   :  { %v750_v33 = vadd.f32 %v749_v29, %v748_v31 }
 0x274   :  { %v597_v9 = vpop.f32.mrf.mxu0  ;;  %v610_v10 = vpop.f32.mrf.mxu1 }
 0x275   :  { %v638_v11 = vpop.f32.mrf.mxu2  ;;  %v651_v12 = vpop.f32.mrf.mxu3 }
 0x276   :  { %v652_v27 = vadd.f32 %v651_v12, %v638_v11 }
 0x278   :  { %v751_v32 = vsel %vm741_vm15, %v652_v27, 0.0 }
 0x279   :  { %v752_v37 = vadd.f32 %v751_v32, %v750_v33 }
 0x27c   :  { %v681_v21 = vpop.f32.mrf.mxu0  ;;  %v694_v22 = vpop.f32.mrf.mxu1 }
 0x27d   :  { %v640_v24 = vpop.f32.mrf.mxu2  ;;  %v653_v25 = vpop.f32.mrf.mxu3  ;;  %v695_v30 = vadd.f32 %v694_v22, %v681_v21 }
 0x27f   :  { %v753_v34 = vsel %vm741_vm15, %v695_v30, 0.0 }
 0x280   :  { %v754_v41 = vadd.f32 %v753_v34, %v752_v37 }
 0x284   :  { %v683_v35 = vpop.f32.mrf.mxu0  ;;  %v696_v36 = vpop.f32.mrf.mxu1 }
 0x285   :  { %v724_v38 = vpop.f32.mrf.mxu2  ;;  %v737_v39 = vpop.f32.mrf.mxu3 }
 0x286   :  { %v738_v40 = vadd.f32 %v737_v39, %v724_v38 }
 0x288   :  { %v755_v43 = vsel %vm741_vm15, %v738_v40, 0.0 }
 0x289   :  { %v756_v44 = vadd.f32 %v755_v43, %v754_v41 }
 0x28b   :  { %v761_v45 = vadd.f32 %v908_v42, %v756_v44 }
 0x28d   :  { %v726_v46 = vpop.f32.mrf.mxu2  ;;  %v739_v47 = vpop.f32.mrf.mxu3  ;;  %762 = vst.msk [vmem:[#allocation3] sm:$0x3] %vm741_vm15, %v761_v45 }
 0x28e   :  { %773 = dma.vmem_to_hbm [thread:$0]  %s769_s21, 32, %s771_s24, [#allocation4]  }
 0x28f   :  { %937 = dma.done.wait [#allocation4], 32  }
 0x290   :  { %938 = vsyncadd [#allocation4], 4294967264 }
 0x291   :  { %778 = vsyncpa [#allocation4], 1 }

</bundles_post_ra>
